<compile_context>
chip_gen: v7x
topology: tpu7x:2x2x1
jax: 0.10.0
libtpu: 0.0.40
codegen_flags: <defaults>
</compile_context>

<pallas_src>
import jax
import jax.numpy as jnp
from jax.experimental import pallas as pl
from jax.experimental.pallas import tpu as pltpu


# ---------------------------------------------------------------------------
# The single fused kernel (built per static config: input_dim, out2, half, n)
# ---------------------------------------------------------------------------
def _make_fused_kernel(input_dim, out2, half, n):
    """Kernel refs (in order):
      x_ref   : (1, in)          VMEM  task_state as a row vector
      slab_ref: (rows, in)       VMEM  packed MLP params:
                                         rows [0, in)        : w1^T
                                         rows [in, 2*in)     : w2^T (cols [0,out2))
                                         row  [2*in]         : b1
      sv_ref  : (2*out2,)        SMEM  b2 | multiplier_bias | offset_bias
      val_refs: n loss-param inputs   (VMEM)
      out_refs: n loss-param outputs  (VMEM)
      o2_sc   : (1, out2)        VMEM scratch for the linear2 output row
    """

    def kernel(*refs):
        x_ref, slab_ref, sv_ref = refs[0], refs[1], refs[2]
        val_refs = refs[3:3 + n]
        out_refs = refs[3 + n:3 + 2 * n]
        o2_sc = refs[3 + 2 * n]

        # Static, 8-aligned row slices of the packed parameter slab (free views).
        w1t = slab_ref[0:input_dim, 0:input_dim]                       # (in, in)
        w2t = slab_ref[input_dim:2 * input_dim, 0:out2]                # (in, out2)
        b1 = slab_ref[2 * input_dim:2 * input_dim + 1, 0:input_dim]    # (1, in)

        # linear1 -> ReLU on the MXU: one tiny (1,in)@(in,in) dot.
        x = x_ref[...]                                                  # (1, in)
        h = jnp.maximum(
            jnp.dot(x, w1t, preferred_element_type=jnp.float32) + b1, 0.0)

        # linear2 on the MXU: one (1,in)@(in,out2) dot producing ALL rows at
        # once (replaces 2n serialized cross-lane reductions).  Stored to a
        # tiny VMEM scratch so per-param scalars are read back as (1,1)
        # windows (no vector->scalar extraction, no HBM round trip).
        o2_sc[...] = jnp.dot(h, w2t, preferred_element_type=jnp.float32)

        for i in range(n):
            gm = o2_sc[0:1, i:i + 1] + sv_ref[i]                        # (1,1)
            go = o2_sc[0:1, half + i:half + i + 1] + sv_ref[half + i]   # (1,1)
            s = 1.0 + sv_ref[out2 + i] * gm                             # scale
            o = sv_ref[out2 + half + i] * go                            # offset
            v = val_refs[i][...].astype(jnp.float32)
            out_refs[i][...] = (s * v + o).astype(out_refs[i].dtype)

    return kernel


# ---------------------------------------------------------------------------
# One-time parameter preparation ("init" time, NOT on the per-call hot path)
# ---------------------------------------------------------------------------
def prepare_params(w1, b1, w2, b2, multiplier_bias, offset_bias):
    w1 = jnp.asarray(w1, jnp.float32)
    b1 = jnp.asarray(b1, jnp.float32).reshape(-1)
    w2 = jnp.asarray(w2, jnp.float32)
    b2 = jnp.asarray(b2, jnp.float32).reshape(-1)
    mb = jnp.asarray(multiplier_bias, jnp.float32).reshape(-1)
    ob = jnp.asarray(offset_bias, jnp.float32).reshape(-1)

    input_dim = w1.shape[1]
    out2 = w2.shape[0]
    # Correctness guards (review): bias lengths must agree with w2's rows,
    # otherwise the kernel would silently read the wrong w2^T columns.
    assert w1.shape == (input_dim, input_dim), "linear1 must be square (in==out)"
    assert w2.shape == (out2, input_dim)
    assert b1.size == input_dim and b2.size == out2
    assert 2 * mb.size == out2 and 2 * ob.size == out2, \
        "multiplier/offset bias length must equal linear2 out_features // 2"
    assert out2 <= input_dim, "packed slab assumes out2 <= input_dim"

    # Packed MLP slab: w1^T rows [0,in), w2^T rows [in,2in) (cols [0,out2)),
    # b1 at row 2in.  Rows padded to a multiple of 8 (sublane-aligned slices).
    rows = 2 * input_dim + 1
    rows_pad = ((rows + 7) // 8) * 8
    slab = jnp.zeros((rows_pad, input_dim), jnp.float32)
    slab = slab.at[0:input_dim, :].set(w1.T)
    slab = slab.at[input_dim:2 * input_dim, 0:out2].set(w2.T)
    slab = slab.at[2 * input_dim, :].set(b1)

    # Scalar vector for SMEM: b2 | multiplier_bias | offset_bias.
    sv = jnp.concatenate([b2, mb, ob]).astype(jnp.float32)

    return {"slab": slab, "sv": sv, "input_dim": input_dim, "out2": out2}


# ---------------------------------------------------------------------------
# Forward (mirrors StepLossAdapter.forward)
# ---------------------------------------------------------------------------
def step_loss_adapter_forward(prepared, task_state, num_step, loss_params):
    tag = "step{}".format(num_step)   # substring match, as in the original module
    matched = [(k, v) for k, v in loss_params.items() if tag in k]
    if not matched:
        return {}

    n = len(matched)
    input_dim = prepared["input_dim"]
    out2 = prepared["out2"]
    half = out2 // 2
    assert n <= half, "more matching loss params than bias entries"

    x_row = jnp.asarray(task_state, jnp.float32).reshape(1, input_dim)

    # Keep params in their native (>=2-D) shapes: no lane-dense round trip.
    kern_vals, orig_shapes = [], []
    for _, v in matched:
        arr = jnp.asarray(v)
        orig_shapes.append(arr.shape)
        if arr.ndim < 2:
            arr = arr.reshape(1, -1)
        kern_vals.append(arr)

    vmem = pl.BlockSpec(memory_space=pltpu.MemorySpace.VMEM)
    smem = pl.BlockSpec(memory_space=pltpu.MemorySpace.SMEM)

    kernel = _make_fused_kernel(input_dim, out2, half, n)
    outs = pl.pallas_call(
        kernel,
        out_shape=tuple(jax.ShapeDtypeStruct(a.shape, a.dtype) for a in kern_vals),
        in_specs=[vmem, vmem, smem] + [vmem] * n,
        out_specs=tuple([vmem] * n),
        scratch_shapes=[pltpu.VMEM((1, out2), jnp.float32)],
    )(x_row, prepared["slab"], prepared["sv"], *kern_vals)

    if not isinstance(outs, (tuple, list)):
        outs = (outs,)

    result = {}
    for (k, _), o, shp in zip(matched, outs, orig_shapes):
        result[k] = o.reshape(shp) if o.shape != shp else o
    return result


# ---------------------------------------------------------------------------
# Pure-JAX reference for correctness checking.
# ---------------------------------------------------------------------------
def _ref_forward(w1, b1, w2, b2, mb, ob, task_state, num_step, loss_params):
    hi = jax.lax.Precision.HIGHEST
    h = jnp.maximum(jnp.dot(task_state, w1.T, precision=hi) + b1, 0.0)
    out = jnp.dot(h, w2.T, precision=hi) + b2
    half = out.shape[-1] // 2
    gm, go = out[:half], out[half:]
    tag = "step{}".format(num_step)
    updated, i = {}, 0
    for key, val in loss_params.items():
        if tag in key:
            updated[key] = (1.0 + mb[i] * gm[i]) * val + ob[i] * go[i]
            i += 1
    return updated


if __name__ == "__main__":
    input_dim = 32
    num_loss_net_layers = 2
    output_dim = num_loss_net_layers * 2 * 2    # 8
    half = output_dim // 2                      # 4

    key = jax.random.PRNGKey(0)
    ks = jax.random.split(key, 8)

    # Deterministic parameter init (shapes per StepLossAdapter.__init__).
    # multiplier_bias / offset_bias are zero-initialized in the module; use
    # small deterministic non-zero values so the affine path is exercised.
    w1 = 0.1 * jax.random.normal(ks[0], (input_dim, input_dim), jnp.float32)
    b1 = 0.1 * jax.random.normal(ks[1], (input_dim,), jnp.float32)
    w2 = 0.1 * jax.random.normal(ks[2], (output_dim, input_dim), jnp.float32)
    b2 = 0.1 * jax.random.normal(ks[3], (output_dim,), jnp.float32)
    mb = 0.05 * jax.random.normal(ks[4], (half,), jnp.float32)
    ob = 0.05 * jax.random.normal(ks[5], (half,), jnp.float32)

    prepared = prepare_params(w1, b1, w2, b2, mb, ob)   # one-time, off hot path

    task_state = jax.random.normal(ks[6], (input_dim,), jnp.float32)

    # Synthetic loss-network params: 2 layers x (weight, bias) x 2 steps.
    loss_params = {}
    pk = jax.random.split(ks[7], 8)
    idx = 0
    for layer in range(num_loss_net_layers):
        for step in range(2):
            loss_params[f"loss_net.layer{layer}.step{step}.weight"] = \
                jax.random.normal(pk[idx], (16, 32), jnp.float32); idx += 1
            loss_params[f"loss_net.layer{layer}.step{step}.bias"] = \
                jax.random.normal(pk[idx], (32,), jnp.float32); idx += 1

    ok = True
    for num_step in (0, 1):
        out = step_loss_adapter_forward(prepared, task_state, num_step, loss_params)
        jax.block_until_ready(out)
        ref = _ref_forward(w1, b1, w2, b2, mb, ob, task_state, num_step, loss_params)
        assert set(out.keys()) == set(ref.keys()) and len(out) == half
        for k in out:
            assert out[k].shape == ref[k].shape, k
            if not jnp.allclose(out[k], ref[k], rtol=1e-3, atol=1e-3):
                ok = False

    if ok:
        print("KERNEL_OK")
</pallas_src>

<mosaic_0001>
module attributes {stable_mosaic.version = 11 : i64} {
  func.func @kernel(%arg0: memref<1x32xf32, #tpu.memory_space<vmem>>, %arg1: memref<72x32xf32, #tpu.memory_space<vmem>>, %arg2: memref<16xf32, #tpu.memory_space<smem>>, %arg3: memref<16x32xf32, #tpu.memory_space<vmem>>, %arg4: memref<1x32xf32, #tpu.memory_space<vmem>>, %arg5: memref<16x32xf32, #tpu.memory_space<vmem>>, %arg6: memref<1x32xf32, #tpu.memory_space<vmem>>, %arg7: memref<16x32xf32, #tpu.memory_space<vmem>>, %arg8: memref<1x32xf32, #tpu.memory_space<vmem>>, %arg9: memref<16x32xf32, #tpu.memory_space<vmem>>, %arg10: memref<1x32xf32, #tpu.memory_space<vmem>>, %arg11: memref<1x8xf32, #tpu.memory_space<vmem>>) attributes {dimension_semantics = [], scalar_prefetch = 0 : i64, scratch_operands = 1 : i64, tpu.core_type = #tpu.core_type<tc>} {
    %c0 = arith.constant 0 : index
    %c0_0 = arith.constant 0 : index
    %0 = vector.load %arg1[%c0, %c0_0] : memref<72x32xf32, #tpu.memory_space<vmem>>, vector<32x32xf32>
    %c32 = arith.constant 32 : index
    %c0_1 = arith.constant 0 : index
    %1 = vector.load %arg1[%c32, %c0_1] : memref<72x32xf32, #tpu.memory_space<vmem>>, vector<32x8xf32>
    %c64 = arith.constant 64 : index
    %c0_2 = arith.constant 0 : index
    %2 = vector.load %arg1[%c64, %c0_2] : memref<72x32xf32, #tpu.memory_space<vmem>>, vector<1x32xf32>
    %c0_3 = arith.constant 0 : index
    %c0_4 = arith.constant 0 : index
    %3 = vector.load %arg0[%c0_3, %c0_4] : memref<1x32xf32, #tpu.memory_space<vmem>>, vector<1x32xf32>
    %cst = arith.constant dense<0.000000e+00> : vector<1x32xf32>
    %4 = tpu.matmul %3, %0, %cst {dimension_numbers = #tpu.dot_dimension_numbers<[1], [0], [0], [1], [0, 0, 1, 1], [], []>} : vector<1x32xf32>, vector<32x32xf32>, vector<1x32xf32> -> vector<1x32xf32>
    %5 = arith.addf %4, %2 : vector<1x32xf32>
    %cst_5 = arith.constant 0.000000e+00 : f32
    %6 = vector.broadcast %cst_5 : f32 to vector<1x32xf32>
    %7 = arith.maximumf %5, %6 : vector<1x32xf32>
    %cst_6 = arith.constant dense<0.000000e+00> : vector<1x8xf32>
    %8 = tpu.matmul %7, %1, %cst_6 {dimension_numbers = #tpu.dot_dimension_numbers<[1], [0], [0], [1], [0, 0, 1, 1], [], []>} : vector<1x32xf32>, vector<32x8xf32>, vector<1x8xf32> -> vector<1x8xf32>
    %c0_7 = arith.constant 0 : index
    %c0_8 = arith.constant 0 : index
    %9 = vector.load %arg11[%c0_7, %c0_8] : memref<1x8xf32, #tpu.memory_space<vmem>>, vector<1x8xf32>
    tpu.vector_store %arg11[%c0_7, %c0_8], %8 {strides = array<i32>} : memref<1x8xf32, #tpu.memory_space<vmem>>, vector<1x8xf32>,
    %c0_9 = arith.constant 0 : index
    %c0_10 = arith.constant 0 : index
    %10 = vector.load %arg11[%c0_9, %c0_10] : memref<1x8xf32, #tpu.memory_space<vmem>>, vector<1x1xf32>
    %c0_11 = arith.constant 0 : index
    %11 = memref.load %arg2[%c0_11] : memref<16xf32, #tpu.memory_space<smem>>
    %12 = vector.broadcast %11 : f32 to vector<1x1xf32>
    %13 = arith.addf %10, %12 : vector<1x1xf32>
    %c0_12 = arith.constant 0 : index
    %c4 = arith.constant 4 : index
    %14 = vector.load %arg11[%c0_12, %c4] : memref<1x8xf32, #tpu.memory_space<vmem>>, vector<1x1xf32>
    %c4_13 = arith.constant 4 : index
    %15 = memref.load %arg2[%c4_13] : memref<16xf32, #tpu.memory_space<smem>>
    %16 = vector.broadcast %15 : f32 to vector<1x1xf32>
    %17 = arith.addf %14, %16 : vector<1x1xf32>
    %c8 = arith.constant 8 : index
    %18 = memref.load %arg2[%c8] : memref<16xf32, #tpu.memory_space<smem>>
    %19 = vector.broadcast %18 : f32 to vector<1x1xf32>
    %20 = arith.mulf %19, %13 : vector<1x1xf32>
    %cst_14 = arith.constant 1.000000e+00 : f32
    %21 = vector.broadcast %cst_14 : f32 to vector<1x1xf32>
    %22 = arith.addf %21, %20 : vector<1x1xf32>
    %c12 = arith.constant 12 : index
    %23 = memref.load %arg2[%c12] : memref<16xf32, #tpu.memory_space<smem>>
    %24 = vector.broadcast %23 : f32 to vector<1x1xf32>
    %25 = arith.mulf %24, %17 : vector<1x1xf32>
    %c0_15 = arith.constant 0 : index
    %c0_16 = arith.constant 0 : index
    %26 = vector.load %arg3[%c0_15, %c0_16] : memref<16x32xf32, #tpu.memory_space<vmem>>, vector<16x32xf32>
    %27 = vector.broadcast %22 : vector<1x1xf32> to vector<16x32xf32>
    %28 = arith.mulf %27, %26 : vector<16x32xf32>
    %29 = vector.broadcast %25 : vector<1x1xf32> to vector<16x32xf32>
    %30 = arith.addf %28, %29 : vector<16x32xf32>
    %c0_17 = arith.constant 0 : index
    %c0_18 = arith.constant 0 : index
    %31 = vector.load %arg7[%c0_17, %c0_18] : memref<16x32xf32, #tpu.memory_space<vmem>>, vector<16x32xf32>
    tpu.vector_store %arg7[%c0_17, %c0_18], %30 {strides = array<i32>} : memref<16x32xf32, #tpu.memory_space<vmem>>, vector<16x32xf32>,
    %c0_19 = arith.constant 0 : index
    %c1 = arith.constant 1 : index
    %32 = vector.load %arg11[%c0_19, %c1] : memref<1x8xf32, #tpu.memory_space<vmem>>, vector<1x1xf32>
    %c1_20 = arith.constant 1 : index
    %33 = memref.load %arg2[%c1_20] : memref<16xf32, #tpu.memory_space<smem>>
    %34 = vector.broadcast %33 : f32 to vector<1x1xf32>
    %35 = arith.addf %32, %34 : vector<1x1xf32>
    %c0_21 = arith.constant 0 : index
    %c5 = arith.constant 5 : index
    %36 = vector.load %arg11[%c0_21, %c5] : memref<1x8xf32, #tpu.memory_space<vmem>>, vector<1x1xf32>
    %c5_22 = arith.constant 5 : index
    %37 = memref.load %arg2[%c5_22] : memref<16xf32, #tpu.memory_space<smem>>
    %38 = vector.broadcast %37 : f32 to vector<1x1xf32>
    %39 = arith.addf %36, %38 : vector<1x1xf32>
    %c9 = arith.constant 9 : index
    %40 = memref.load %arg2[%c9] : memref<16xf32, #tpu.memory_space<smem>>
    %41 = vector.broadcast %40 : f32 to vector<1x1xf32>
    %42 = arith.mulf %41, %35 : vector<1x1xf32>
    %cst_23 = arith.constant 1.000000e+00 : f32
    %43 = vector.broadcast %cst_23 : f32 to vector<1x1xf32>
    %44 = arith.addf %43, %42 : vector<1x1xf32>
    %c13 = arith.constant 13 : index
    %45 = memref.load %arg2[%c13] : memref<16xf32, #tpu.memory_space<smem>>
    %46 = vector.broadcast %45 : f32 to vector<1x1xf32>
    %47 = arith.mulf %46, %39 : vector<1x1xf32>
    %c0_24 = arith.constant 0 : index
    %c0_25 = arith.constant 0 : index
    %48 = vector.load %arg4[%c0_24, %c0_25] : memref<1x32xf32, #tpu.memory_space<vmem>>, vector<1x32xf32>
    %49 = vector.broadcast %44 : vector<1x1xf32> to vector<1x32xf32>
    %50 = arith.mulf %49, %48 : vector<1x32xf32>
    %51 = vector.broadcast %47 : vector<1x1xf32> to vector<1x32xf32>
    %52 = arith.addf %50, %51 : vector<1x32xf32>
    %c0_26 = arith.constant 0 : index
    %c0_27 = arith.constant 0 : index
    %53 = vector.load %arg8[%c0_26, %c0_27] : memref<1x32xf32, #tpu.memory_space<vmem>>, vector<1x32xf32>
    tpu.vector_store %arg8[%c0_26, %c0_27], %52 {strides = array<i32>} : memref<1x32xf32, #tpu.memory_space<vmem>>, vector<1x32xf32>,
    %c0_28 = arith.constant 0 : index
    %c2 = arith.constant 2 : index
    %54 = vector.load %arg11[%c0_28, %c2] : memref<1x8xf32, #tpu.memory_space<vmem>>, vector<1x1xf32>
    %c2_29 = arith.constant 2 : index
    %55 = memref.load %arg2[%c2_29] : memref<16xf32, #tpu.memory_space<smem>>
    %56 = vector.broadcast %55 : f32 to vector<1x1xf32>
    %57 = arith.addf %54, %56 : vector<1x1xf32>
    %c0_30 = arith.constant 0 : index
    %c6 = arith.constant 6 : index
    %58 = vector.load %arg11[%c0_30, %c6] : memref<1x8xf32, #tpu.memory_space<vmem>>, vector<1x1xf32>
    %c6_31 = arith.constant 6 : index
    %59 = memref.load %arg2[%c6_31] : memref<16xf32, #tpu.memory_space<smem>>
    %60 = vector.broadcast %59 : f32 to vector<1x1xf32>
    %61 = arith.addf %58, %60 : vector<1x1xf32>
    %c10 = arith.constant 10 : index
    %62 = memref.load %arg2[%c10] : memref<16xf32, #tpu.memory_space<smem>>
    %63 = vector.broadcast %62 : f32 to vector<1x1xf32>
    %64 = arith.mulf %63, %57 : vector<1x1xf32>
    %cst_32 = arith.constant 1.000000e+00 : f32
    %65 = vector.broadcast %cst_32 : f32 to vector<1x1xf32>
    %66 = arith.addf %65, %64 : vector<1x1xf32>
    %c14 = arith.constant 14 : index
    %67 = memref.load %arg2[%c14] : memref<16xf32, #tpu.memory_space<smem>>
    %68 = vector.broadcast %67 : f32 to vector<1x1xf32>
    %69 = arith.mulf %68, %61 : vector<1x1xf32>
    %c0_33 = arith.constant 0 : index
    %c0_34 = arith.constant 0 : index
    %70 = vector.load %arg5[%c0_33, %c0_34] : memref<16x32xf32, #tpu.memory_space<vmem>>, vector<16x32xf32>
    %71 = vector.broadcast %66 : vector<1x1xf32> to vector<16x32xf32>
    %72 = arith.mulf %71, %70 : vector<16x32xf32>
    %73 = vector.broadcast %69 : vector<1x1xf32> to vector<16x32xf32>
    %74 = arith.addf %72, %73 : vector<16x32xf32>
    %c0_35 = arith.constant 0 : index
    %c0_36 = arith.constant 0 : index
    %75 = vector.load %arg9[%c0_35, %c0_36] : memref<16x32xf32, #tpu.memory_space<vmem>>, vector<16x32xf32>
    tpu.vector_store %arg9[%c0_35, %c0_36], %74 {strides = array<i32>} : memref<16x32xf32, #tpu.memory_space<vmem>>, vector<16x32xf32>,
    %c0_37 = arith.constant 0 : index
    %c3 = arith.constant 3 : index
    %76 = vector.load %arg11[%c0_37, %c3] : memref<1x8xf32, #tpu.memory_space<vmem>>, vector<1x1xf32>
    %c3_38 = arith.constant 3 : index
    %77 = memref.load %arg2[%c3_38] : memref<16xf32, #tpu.memory_space<smem>>
    %78 = vector.broadcast %77 : f32 to vector<1x1xf32>
    %79 = arith.addf %76, %78 : vector<1x1xf32>
    %c0_39 = arith.constant 0 : index
    %c7 = arith.constant 7 : index
    %80 = vector.load %arg11[%c0_39, %c7] : memref<1x8xf32, #tpu.memory_space<vmem>>, vector<1x1xf32>
    %c7_40 = arith.constant 7 : index
    %81 = memref.load %arg2[%c7_40] : memref<16xf32, #tpu.memory_space<smem>>
    %82 = vector.broadcast %81 : f32 to vector<1x1xf32>
    %83 = arith.addf %80, %82 : vector<1x1xf32>
    %c11 = arith.constant 11 : index
    %84 = memref.load %arg2[%c11] : memref<16xf32, #tpu.memory_space<smem>>
    %85 = vector.broadcast %84 : f32 to vector<1x1xf32>
    %86 = arith.mulf %85, %79 : vector<1x1xf32>
    %cst_41 = arith.constant 1.000000e+00 : f32
    %87 = vector.broadcast %cst_41 : f32 to vector<1x1xf32>
    %88 = arith.addf %87, %86 : vector<1x1xf32>
    %c15 = arith.constant 15 : index
    %89 = memref.load %arg2[%c15] : memref<16xf32, #tpu.memory_space<smem>>
    %90 = vector.broadcast %89 : f32 to vector<1x1xf32>
    %91 = arith.mulf %90, %83 : vector<1x1xf32>
    %c0_42 = arith.constant 0 : index
    %c0_43 = arith.constant 0 : index
    %92 = vector.load %arg6[%c0_42, %c0_43] : memref<1x32xf32, #tpu.memory_space<vmem>>, vector<1x32xf32>
    %93 = vector.broadcast %88 : vector<1x1xf32> to vector<1x32xf32>
    %94 = arith.mulf %93, %92 : vector<1x32xf32>
    %95 = vector.broadcast %91 : vector<1x1xf32> to vector<1x32xf32>
    %96 = arith.addf %94, %95 : vector<1x32xf32>
    %c0_44 = arith.constant 0 : index
    %c0_45 = arith.constant 0 : index
    %97 = vector.load %arg10[%c0_44, %c0_45] : memref<1x32xf32, #tpu.memory_space<vmem>>, vector<1x32xf32>
    tpu.vector_store %arg10[%c0_44, %c0_45], %96 {strides = array<i32>} : memref<1x32xf32, #tpu.memory_space<vmem>>, vector<1x32xf32>,
    return
  }
}

</mosaic_0001>

<bundles_post_ra>
// kernel: tpu_custom_call.1
= control target key start
LH: loop header
LB: loop body
LE: loop exit
PB: predicated region body
PF: predicated region fallthrough
CT: control target
= control target key end

     0   :  { %16 = vsyncpa [#allocation5], 0  ;;  %s843_s0 = inlined_call_operand.vmem [shape: f32[1,32], index: 0, kind: input, shape index: {}]   ;;  %s844_s1 = inlined_call_operand.vmem [shape: f32[72,32], index: 1, kind: input, shape index: {}]   ;;  %s845_s2 = inlined_call_operand.vmem [shape: f32[16], index: 2, kind: input, shape index: {}]   ;;  %s846_s3 = inlined_call_operand.vmem [shape: f32[16,32], index: 3, kind: input, shape index: {}]   ;;  %s847_s4 = inlined_call_operand.vmem [shape: f32[1,32], index: 4, kind: input, shape index: {}]   ;;  %s848_s5 = inlined_call_operand.vmem [shape: f32[16,32], index: 5, kind: input, shape index: {}]   ;;  %s849_s6 = inlined_call_operand.vmem [shape: f32[1,32], index: 6, kind: input, shape index: {}]   ;;  %s850_s7 = inlined_call_operand.hbm [shape: f32[16,32], index: 7, kind: output, shape index: {0}]   ;;  %s851_s8 = inlined_call_operand.hbm [shape: f32[1,32], index: 8, kind: output, shape index: {1}]   ;;  %s852_s9 = inlined_call_operand.hbm [shape: f32[16,32], index: 9, kind: output, shape index: {2}]   ;;  %s853_s10 = inlined_call_operand.hbm [shape: f32[1,32], index: 10, kind: output, shape index: {3}]  }
   0x1   :  { %17 = vsyncpa [#allocation4], 0 }
   0x2   :  { %18 = vsyncpa [#allocation8], 0 }
   0x3   :  { %19 = vsyncpa [#allocation11], 0  ;;  %s30_s15 = sshll.u32 %s845_s2, 4  ;;  %s31_s15 = int_to_ptr.vmem [resolvable:$true] %s30_s15 }
   0x4   :  { %s506_s16 = scalar_lea.vmem %s31_s15, 16  ;;  %p511_p1 = scmp.lt.s32.totalorder %s31_s15, %s31_s15 }
   0x5   :  { %p507_p0 = scmp.ne.s32.totalorder %s31_s15, %s506_s16  ;;  %p512_p2 = scmp.lt.s32.totalorder %s506_s16, %s506_s16 }
   0x7   :  { %p513_p3 = por %p512_p2, %p511_p1 }
   0x9   :  { %p514_p4 = pnand %p513_p3, %p507_p0 }
   0xb   :  { %517 = shalt.err (!%p514_p4)
}
   0xc   :  { %s614_s17 = smov [#allocation3]  }
   0xd   :  { %33 = dma.vmem_to_smem %s31_s15, 16, %s614_s17, [#allocation5]  }
   0xe   :  { %606 = dma.done.wait [#allocation5], 16  }
   0xf   :  { %607 = vsyncadd [#allocation5], 4294967280 }
  0x10   :  { %45 = sfence }
  0x11   :  { %v46_v0 = vld [vmem:[%s844_s1] sm:$0xff]  ;;  %v47_v1 = vld [vmem:[%s844_s1 + $0x8] sm:$0xff]  ;;  %v48_v2 = vld [vmem:[%s844_s1 + $0x10] sm:$0xff]  ;;  %v615_v3 = vmov 0.0|0.0   ;;  %vm616_vm0 = vmmov 0   ;;  %v617_v6 = vmov 0.0   ;;  %v223_v24 = vlaneseq }
  0x12   :  { %468 = vmatprep.subr.bf16.mxu0 %v615_v3  ;;  %v469_v4 = vpack.c.bf16 %v47_v1, %v46_v0  ;;  %v49_v5 = vld [vmem:[%s844_s1 + $0x18] sm:$0xff]  ;;  %454 = vmatprep.mubr.msk.f32.mxu0 %vm616_vm0, %v617_v6  ;;  %v50_v7 = vld [vmem:[%s844_s1 + $0x20] sm:$0xff]  ;;  %v51_v8 = vld [vmem:[%s844_s1 + $0x28] sm:$0xff]  ;;  %vm56_vm1 = vcmask 261120   ;;  %v618_v20 = vmov 5   ;;  %v619_v21 = vmov 1  }
  0x13   :  { %474 = vmatprep.subr.bf16.mxu1 %v615_v3  ;;  %465 = vmatprep.mubr.msk.f32.mxu1 %vm616_vm0, %v617_v6  ;;  %v472_v9 = vpack.c.bf16 %v49_v5, %v48_v2  ;;  %v475_v10 = vpack.c.bf16 %v51_v8, %v50_v7  ;;  %v55_v11 = vld [vmem:[%s843_s0] sm:$0x1]  ;;  %v52_v12 = vld [vmem:[%s844_s1 + $0x30] sm:$0xff]  ;;  %v53_v13 = vld [vmem:[%s844_s1 + $0x38] sm:$0xff]  ;;  %s425_s0 = sld [smem:[#allocation3 + $0x5]]  ;;  %vm204_vm2 = vcmask 57344  }
  0x14   :  { %470 = vmatpush3.bf16.msra.mxu0 %v469_v4  ;;  %v478_v14 = vpack.c.bf16 %v53_v13, %v52_v12  ;;  %v54_v15 = vld [vmem:[%s844_s1 + $0x40] sm:$0x1]  ;;  %498 = vset.pattern.permute.xlu1 %v618_v20  ;;  %s424_s17 = sld [smem:[#allocation3 + $0x1]]  ;;  %s421_s18 = sld [smem:[#allocation3 + $0x4]]  ;;  %v224_v28 = vshrl.u32 %v223_v24, 7  ;;  %v620_v57 = vmov 4  }
  0x15   :  { %471 = vmatprep.subr.bf16.mxu0 %v615_v3  ;;  %476 = vmatpush3.bf16.msra.mxu1 %v475_v10  ;;  %s432_s19 = sld [smem:[#allocation3 + $0x3]]  ;;  %s207_s20 = sld [smem:[#allocation3]]  ;;  %v621_v61 = vmov 3   ;;  %v622_v2 = vmov 0   ;;  %v623_v6 = vmov 7   ;;  %v625_v12 = vmov 6  }
  0x16   :  { %477 = vmatprep.subr.bf16.mxu1 %v615_v3  ;;  %499 = vset.pattern.permute.xlu0 %v619_v21  ;;  %s427_s21 = sld [smem:[#allocation3 + $0xd]]  ;;  %s426_s2 = sld [smem:[#allocation3 + $0x9]]  ;;  %v738_v49 = vsub.s32 0, %v224_v28  ;;  %vm281_vm3 = vcmask 253952  }
  0x17   :  { %s722_s1 = sld [smem:[#allocation3 + $0xc]]  ;;  %s724_s22 = sld [smem:[#allocation3 + $0x8]] }
  0x18   :  { %473 = vmatpush3.bf16.msra.mxu0 %v472_v9  ;;  %s726_s23 = sld [smem:[#allocation3 + $0xb]]  ;;  %s728_s24 = sld [smem:[#allocation3 + $0x2]]  ;;  %v624_v9 = vmov 2  }
  0x19   :  { %479 = vmatpush3.bf16.msra.mxu1 %v478_v14  ;;  %v251_v25 = vstv %s425_s0  ;;  %s730_s25 = sld [smem:[#allocation3 + $0x7]]  ;;  %s732_s26 = sld [smem:[#allocation3 + $0xa]]  ;;  %v260_v14 = vld [vmem:[%s847_s4] sm:$0x1] }
  0x1a   :  { %v248_v26 = vstv %s424_s17  ;;  %v211_v27 = vstv %s421_s18  ;;  %s435_s27 = sld [smem:[#allocation3 + $0xf]]  ;;  %s429_s28 = sld [smem:[#allocation3 + $0x6]] }
  0x1b   :  { %455 = vmatmul.mubr.msk.f32.vlgmr.msra.gmra.mrb[0].mxu0 %vm56_vm1, %v55_v11  ;;  %v325_v29 = vstv %s432_s19  ;;  %v208_v30 = vstv %s207_s20  ;;  %s431_s29 = sld [smem:[#allocation3 + $0xe]]  ;;  %s626_s12 = smov [#allocation7]  }
  0x1c   :  { %v258_v32 = vstv %s427_s21  ;;  %v254_v33 = vstv %s426_s2  ;;  %s377_s13 = sshll.u32 %s626_s12, 4  ;;  %s627_s4 = smov [#allocation6]   ;;  %s378_s13 = int_to_ptr.vmem [resolvable:$true] %s377_s13 }
  0x1d   :  { %v218_v39 = vstv %s722_s1  ;;  %v214_v42 = vstv %s724_s22  ;;  %s364_s17 = sshll.u32 %s627_s4, 4  ;;  %s518_s20 = scalar_lea.vmem %s378_s13, 16  ;;  %s774_s17 = int_to_ptr.vmem [resolvable:$true] %s364_s17 }
  0x1e   :  { %v331_v45 = vstv %s726_s23  ;;  %v285_v47 = vstv %s728_s24  ;;  %p519_p5 = scmp.ne.s32.totalorder %s378_s13, %s518_s20  ;;  %s522_s21 = scalar_lea.vmem %s378_s13, 32 }
  0x1f   :  { %v291_v54 = vstv %s732_s26  ;;  %v328_v56 = vstv %s730_s25  ;;  %p523_p6 = scmp.lt.s32.totalorder %s378_s13, %s378_s13  ;;  %p524_p7 = scmp.lt.s32.totalorder %s522_s21, %s518_s20 }
  0x20   :  { %v335_v63 = vstv %s435_s27  ;;  %v288_v0 = vstv %s429_s28 }
  0x21   :  { %v295_v7 = vstv %s431_s29  ;;  %p525_p8 = por %p524_p7, %p523_p6 }
  0x23   :  { %p526_p9 = pnand %p525_p8, %p519_p5 }
  0xee   :  { %v126_v16 = vpop.f32.mrb[0].mxu0 }
  0xef   :  { %v127_v17 = vadd.f32 %v126_v16, %v54_v15  ;;  %v456_v18 = vpop.f32.mrb[1].mxu0 }
  0xf1   :  { %v130_v19 = vmax.f32 %v127_v17, 0.0 }
  0xf3   :  { %466 = vmatmul.mubr.msk.f32.vlgmr.msra.gmra.mrb[0].mxu1 %vm56_vm1, %v130_v19 }
 0x1c6   :  { %v200_v22 = vpop.f32.mrb[0].mxu1 }
 0x1c7   :  { %205 = vst.msk [vmem:[#allocation2] sm:$0x1] %vm204_vm2, %v200_v22  ;;  %v467_v23 = vpop.f32.mrb[1].mxu1  ;;  %v220_v22 = vld [vmem:[%s846_s3] sm:$0xff] }
 0x1c8   :  { %v221_v23 = vld [vmem:[%s846_s3 + $0x8] sm:$0xff] }
 0x1ce   :  { %v246_v31 = vld [vmem:[#allocation2] sm:$0x1] }
 0x1cf   :  { %v206_v34 = vld [vmem:[#allocation2] sm:$0x1]  ;;  %v252_v36 = vadd.f32 %v251_v25, %v246_v31  ;;  %v249_v37 = vadd.f32 %v248_v26, %v246_v31 }
 0x1d0   :  { %v323_v35 = vld [vmem:[#allocation2] sm:$0x1]  ;;  %v212_v38 = vadd.f32 %v211_v27, %v206_v34  ;;  %v209_v41 = vadd.f32 %v208_v30, %v206_v34 }
 0x1d1   :  { %v326_v40 = vadd.f32 %v325_v29, %v323_v35  ;;  %v259_v43 = vmul.f32 %v258_v32, %v252_v36  ;;  %v255_v44 = vmul.f32 %v254_v33, %v249_v37  ;;  %v283_v46 = vld [vmem:[#allocation2] sm:$0x1]  ;;  %v329_v62 = vadd.f32 %v328_v56, %v323_v35 }
 0x1d2   :  { %v219_v48 = vmul.f32 %v218_v39, %v212_v38  ;;  %v215_v51 = vmul.f32 %v214_v42, %v209_v41  ;;  %v286_v53 = vadd.f32 %v285_v47, %v283_v46  ;;  %v289_v5 = vadd.f32 %v288_v0, %v283_v46  ;;  %v337_v25 = vld [vmem:[%s849_s6] sm:$0x1] }
 0x1d3   :  { %273 = vperm.xlu1 %498, %v259_v43   ;;  %v256_v50 = vadd.f32 1.0, %v255_v44  ;;  %v332_v52 = vmul.f32 %v331_v45, %v326_v40  ;;  %v336_v4 = vmul.f32 %v335_v63, %v329_v62 }
 0x1d4   :  { %v237_v55 = vrot.slane %v219_v48, %v738_v49  ;;  %v216_v58 = vadd.f32 1.0, %v215_v51  ;;  %v292_v60 = vmul.f32 %v291_v54, %v286_v53  ;;  %v296_v10 = vmul.f32 %v295_v7, %v289_v5 }
 0x1d5   :  { %263 = vperm.xlu0 %499, %v256_v50   ;;  %v333_v59 = vadd.f32 1.0, %v332_v52 }
 0x1d6   :  { %v226_v1 = vrot.slane %v216_v58, %v738_v49  ;;  %v293_v3 = vadd.f32 1.0, %v292_v60  ;;  %v314_v11 = vrot.slane %v296_v10, %v738_v49 }
 0x1d7   :  { %502 = vset.pattern.permute.xlu1 %v620_v57 }
 0x1d8   :  { %239 = vperm.xlu1 %502, %v237_v55   ;;  %v303_v8 = vrot.slane %v293_v3, %v738_v49 }
 0x1d9   :  { %500 = vset.pattern.permute.xlu0 %v621_v61 }
 0x1da   :  { %340 = vperm.xlu0 %500, %v333_v59  }
 0x1dc   :  { %503 = vset.pattern.permute.xlu1 %v622_v2 }
 0x1dd   :  { %228 = vperm.xlu1 %503, %v226_v1  }
 0x1de   :  { %501 = vset.pattern.permute.xlu0 %v623_v6 }
 0x1df   :  { %350 = vperm.xlu0 %501, %v336_v4  }
 0x1e1   :  { %504 = vset.pattern.permute.xlu1 %v624_v9 }
 0x1e2   :  { %305 = vperm.xlu1 %504, %v303_v8  }
 0x1e6   :  { %505 = vset.pattern.permute.xlu1 %v625_v12 }
 0x1e7   :  { %316 = vperm.xlu1 %505, %v314_v11  }
 0x252   :  { %v274_v13 = vpop.permute.xlu1 %273 }
 0x253   :  { %v279_v17 = vrot.slane %v274_v13, %v738_v49 }
 0x254   :  { %v264_v15 = vpop.permute.xlu0 %263 }
 0x255   :  { %v269_v16 = vrot.slane %v264_v15, %v738_v49 }
 0x257   :  { %v270_v18 = vmul.f32 %v269_v16, %v260_v14  ;;  %v240_v19 = vpop.permute.xlu1 %239 }
 0x259   :  { %v341_v20 = vpop.permute.xlu0 %340  ;;  %v280_v21 = vadd.f32 %v279_v17, %v270_v18 }
 0x25a   :  { %v346_v24 = vrot.slane %v341_v20, %v738_v49 }
 0x25b   :  { %282 = vst.msk [vmem:[#allocation7] sm:$0x1] %vm281_vm3, %v280_v21 }
 0x25c   :  { %v229_v26 = vpop.permute.xlu1 %228 }
 0x25d   :  { %529 = shalt.err (!%p526_p9)
}
 0x25e   :  { %s530_s1 = scalar_lea.hbm %s851_s8, 16 }
 0x25f   :  { %p531_p10 = scmp.ne.s32.totalorder %s851_s8, %s530_s1  ;;  %p534_p11 = scmp.lt.u32.totalorder %s530_s1, %s851_s8 }
 0x261   :  { %p536_p12 = pnand %p534_p11, %p531_p10 }
 0x263   :  { %539 = shalt.err (!%p536_p12)
}
 0x264   :  { %380 = dma.vmem_to_hbm [thread:$0]  %s378_s13, 16, %s851_s8, [#allocation8]   ;;  %v231_v27 = vmul.f32 %v229_v26, %v220_v22  ;;  %v232_v28 = vmul.f32 %v229_v26, %v221_v23  ;;  %v351_v29 = vpop.permute.xlu0 %350  ;;  %v347_v30 = vmul.f32 %v346_v24, %v337_v25  ;;  %v297_v34 = vld [vmem:[%s848_s5] sm:$0xff]  ;;  %v298_v35 = vld [vmem:[%s848_s5 + $0x8] sm:$0xff]  ;;  %v306_v36 = vpop.permute.xlu1 %305 }
 0x265   :  { %s628_s27 = smov [#allocation10]   ;;  %v356_v33 = vrot.slane %v351_v29, %v738_v49  ;;  %s540_s12 = scalar_lea.vmem %s774_s17, 256 }
 0x266   :  { %s399_s28 = sshll.u32 %s628_s27, 4  ;;  %v242_v31 = vadd.f32 %v240_v19, %v231_v27  ;;  %v243_v32 = vadd.f32 %v240_v19, %v232_v28  ;;  %p541_p13 = scmp.ne.s32.totalorder %s774_s17, %s540_s12  ;;  %s785_s28 = int_to_ptr.vmem [resolvable:$true] %s399_s28 }
 0x267   :  { %v357_v37 = vadd.f32 %v356_v33, %v347_v30  ;;  %p545_p0 = scmp.lt.s32.totalorder %s774_s17, %s774_s17  ;;  %p546_p1 = scmp.lt.s32.totalorder %s540_s12, %s540_s12 }
 0x268   :  { %244 = vst.msk [vmem:[#allocation6] sm:$0xff] %vm56_vm1, %v242_v31  ;;  %245 = vst.msk [vmem:[#allocation6 + $0x8] sm:$0xff] %vm56_vm1, %v243_v32 }
 0x269   :  { %p547_p2 = por %p546_p1, %p545_p0 }
 0x26b   :  { %p548_p3 = pnand %p547_p2, %p541_p13 }
 0x26d   :  { %551 = shalt.err (!%p548_p3)
}
 0x26e   :  { %s552_s15 = scalar_lea.hbm %s850_s7, 256 }
 0x26f   :  { %p553_p4 = scmp.ne.s32.totalorder %s850_s7, %s552_s15  ;;  %p556_p5 = scmp.lt.u32.totalorder %s552_s15, %s850_s7 }
 0x271   :  { %p558_p6 = pnand %p556_p5, %p553_p4 }
 0x273   :  { %561 = shalt.err (!%p558_p6)
}
 0x274   :  { %s629_s18 = smov 128   ;;  %s630_s19 = smov 8   ;;  %358 = vst.msk [vmem:[#allocation10] sm:$0x1] %vm281_vm3, %v357_v37 }
 0x275   :  { %370 = dma.vmem_to_hbm [thread:$0]  %s774_s17, 256, %s850_s7, [#allocation4], %s629_s18, %s629_s18, %s630_s19  }
 0x276   :  { %s631_s3 = smov [#allocation9]   ;;  %s562_s1 = scalar_lea.vmem %s785_s28, 16 }
 0x277   :  { %s386_s2 = sshll.u32 %s631_s3, 4  ;;  %p563_p7 = scmp.ne.s32.totalorder %s785_s28, %s562_s1  ;;  %s387_s2 = int_to_ptr.vmem [resolvable:$true] %s386_s2 }
 0x278   :  { %s566_s22 = scalar_lea.vmem %s785_s28, 32  ;;  %p567_p8 = scmp.lt.s32.totalorder %s785_s28, %s785_s28 }
 0x279   :  { %p568_p9 = scmp.lt.s32.totalorder %s566_s22, %s562_s1 }
 0x27b   :  { %p569_p10 = por %p568_p9, %p567_p8 }
 0x27d   :  { %p570_p11 = pnand %p569_p10, %p563_p7 }
 0x27f   :  { %573 = shalt.err (!%p570_p11)
}
 0x280   :  { %s574_s25 = scalar_lea.hbm %s853_s10, 16 }
 0x281   :  { %p575_p12 = scmp.ne.s32.totalorder %s853_s10, %s574_s25  ;;  %p578_p13 = scmp.lt.u32.totalorder %s574_s25, %s853_s10 }
 0x283   :  { %p580_p0 = pnand %p578_p13, %p575_p12 }
 0x285   :  { %583 = shalt.err (!%p580_p0)
}
 0x286   :  { %402 = dma.vmem_to_hbm [thread:$0]  %s785_s28, 16, %s853_s10, [#allocation11]   ;;  %v308_v38 = vmul.f32 %v306_v36, %v297_v34  ;;  %v309_v39 = vmul.f32 %v306_v36, %v298_v35  ;;  %v317_v40 = vpop.permute.xlu1 %316 }
 0x287   :  { %s584_s29 = scalar_lea.vmem %s387_s2, 256  ;;  %p589_p2 = scmp.lt.s32.totalorder %s387_s2, %s387_s2 }
 0x288   :  { %v319_v41 = vadd.f32 %v317_v40, %v308_v38  ;;  %v320_v42 = vadd.f32 %v317_v40, %v309_v39  ;;  %p585_p1 = scmp.ne.s32.totalorder %s387_s2, %s584_s29  ;;  %p590_p3 = scmp.lt.s32.totalorder %s584_s29, %s584_s29 }
 0x28a   :  { %321 = vst.msk [vmem:[#allocation9] sm:$0xff] %vm56_vm1, %v319_v41  ;;  %322 = vst.msk [vmem:[#allocation9 + $0x8] sm:$0xff] %vm56_vm1, %v320_v42  ;;  %p591_p4 = por %p590_p3, %p589_p2 }
 0x28c   :  { %p592_p5 = pnand %p591_p4, %p585_p1 }
 0x28e   :  { %595 = shalt.err (!%p592_p5)
}
 0x28f   :  { %s596_s10 = scalar_lea.hbm %s852_s9, 256 }
 0x290   :  { %p597_p6 = scmp.ne.s32.totalorder %s852_s9, %s596_s10  ;;  %p600_p7 = scmp.lt.u32.totalorder %s596_s10, %s852_s9 }
 0x292   :  { %p602_p8 = pnand %p600_p7, %p597_p6 }
 0x294   :  { %605 = shalt.err (!%p602_p8)
}
 0x295   :  { %392 = dma.vmem_to_hbm [thread:$0]  %s387_s2, 256, %s852_s9, [#allocation8], %s629_s18, %s629_s18, %s630_s19  }
 0x296   :  { %608 = dma.done.wait [#allocation4], 256  }
 0x297   :  { %609 = vsyncadd [#allocation4], 4294967040 }
 0x298   :  { %610 = dma.done.wait [#allocation8], 272  }
 0x299   :  { %611 = vsyncadd [#allocation8], 4294967024 }
 0x29a   :  { %612 = dma.done.wait [#allocation11], 16  }
 0x29b   :  { %613 = vsyncadd [#allocation11], 4294967280 }
 0x29c   :  { %415 = vsyncpa [#allocation4], 1 }
 0x29d   :  { %416 = vsyncpa [#allocation8], 1 }
 0x29e   :  { %417 = vsyncpa [#allocation11], 1 }
 0x29f   :  { %418 = vsyncpa [#allocation5], 1 }

</bundles_post_ra>
